<compile_context>
chip_gen: v7x
topology: tpu7x:2x2x1
jax: 0.10.0
libtpu: 0.0.40
codegen_flags: <defaults>
</compile_context>

<pallas_src>
import functools

import jax
import jax.numpy as jnp
from jax.experimental import pallas as pl
from jax.experimental.pallas import tpu as pltpu

LANE = 128          # feature-dim padding granule (vreg lane width)
SUBLANE = 8         # row-dim padding granule
NODE_TILE = 512     # preferred node tile (rows and k) for adj propagation
GRAPH_TILE = 256    # preferred graph-row tile for pooling / head
VMEM_LIMIT_BYTES = 48 * 1024 * 1024   # < v7x 64 MiB physical, > default scoped limits


def _round_up(x, m):
    return (x + m - 1) // m * m


def _tile_and_pad(n, pref, align=SUBLANE):
    """Pick a tile size and a padded extent such that tile divides the extent."""
    t = pref if n >= pref else _round_up(n, align)
    return t, _round_up(n, t)


# ----------------------------------------------------------------------------
# Kernel 1: fused Linear + adjacency propagation + ReLU, tiled over nodes.
#   z[i_tile, :] = relu( sum_k adj[i_tile, k_tile] @ (x[k_tile] @ Wt + b) )
# bf16 MXU inputs, f32 accumulation in VMEM scratch.
# ----------------------------------------------------------------------------
def _gcn_layer_kernel(adj_ref, x_ref, wt_ref, b_ref, o_ref, acc_ref):
    k = pl.program_id(1)

    @pl.when(k == 0)
    def _():
        acc_ref[...] = jnp.zeros_like(acc_ref)

    # h = x_tile @ Wt + b   (bf16 x bf16 -> f32), then cast to bf16 for the MXU
    h = jnp.dot(x_ref[...], wt_ref[...], preferred_element_type=jnp.float32)
    h = h + b_ref[...]
    acc_ref[...] += jnp.dot(adj_ref[...], h.astype(jnp.bfloat16),
                            preferred_element_type=jnp.float32)

    @pl.when(k == pl.num_programs(1) - 1)
    def _():
        o_ref[...] = jnp.maximum(acc_ref[...], 0.0).astype(o_ref.dtype)


def gcn_layer(adj, x, wt, b, *, tile):
    n = adj.shape[0]
    d_pad = x.shape[1]
    h_pad = wt.shape[1]
    grid = (n // tile, n // tile)
    return pl.pallas_call(
        _gcn_layer_kernel,
        out_shape=jax.ShapeDtypeStruct((n, h_pad), jnp.bfloat16),
        grid_spec=pltpu.PrefetchScalarGridSpec(
            num_scalar_prefetch=0,
            grid=grid,
            in_specs=[
                pl.BlockSpec((tile, tile), lambda i, k: (i, k)),     # adj tile
                pl.BlockSpec((tile, d_pad), lambda i, k: (k, 0)),    # x rows (k)
                pl.BlockSpec((d_pad, h_pad), lambda i, k: (0, 0)),   # Wt (whole)
                pl.BlockSpec((1, h_pad), lambda i, k: (0, 0)),       # bias
            ],
            out_specs=pl.BlockSpec((tile, h_pad), lambda i, k: (i, 0)),
            scratch_shapes=[pltpu.VMEM((tile, h_pad), jnp.float32)],
        ),
        compiler_params=pltpu.CompilerParams(
            dimension_semantics=("parallel", "arbitrary"),
            vmem_limit_bytes=VMEM_LIMIT_BYTES,
        ),
    )(adj, x, wt, b)


# ----------------------------------------------------------------------------
# Kernel 2: segment-sum pooling as a tiled one-hot matmul.
#   out[g_tile, :] = sum_{node tiles} one_hot(idx_tile)[g_tile, :] @ z_tile
# ----------------------------------------------------------------------------
def _pool_kernel(idx_ref, z_ref, o_ref, acc_ref):
    ki = pl.program_id(1)

    @pl.when(ki == 0)
    def _():
        acc_ref[...] = jnp.zeros_like(acc_ref)

    tg, tn = acc_ref.shape[0], z_ref.shape[0]
    gids = pl.program_id(0) * tg + jax.lax.broadcasted_iota(jnp.int32, (tg, tn), 0)
    one_hot = (idx_ref[...] == gids).astype(jnp.bfloat16)       # (1,tn) vs (tg,tn)
    acc_ref[...] += jnp.dot(one_hot, z_ref[...],
                            preferred_element_type=jnp.float32)

    @pl.when(ki == pl.num_programs(1) - 1)
    def _():
        o_ref[...] = acc_ref[...]


def segment_sum_pool(idx_p, z, g_pad, *, tg, tn):
    n_pad, h_pad = z.shape
    grid = (g_pad // tg, n_pad // tn)
    return pl.pallas_call(
        _pool_kernel,
        out_shape=jax.ShapeDtypeStruct((g_pad, h_pad), jnp.float32),
        grid_spec=pltpu.PrefetchScalarGridSpec(
            num_scalar_prefetch=0,
            grid=grid,
            in_specs=[
                pl.BlockSpec((1, tn), lambda gi, ki: (0, ki)),       # idx slice
                pl.BlockSpec((tn, h_pad), lambda gi, ki: (ki, 0)),   # z1 rows
            ],
            out_specs=pl.BlockSpec((tg, h_pad), lambda gi, ki: (gi, 0)),
            scratch_shapes=[pltpu.VMEM((tg, h_pad), jnp.float32)],
        ),
        compiler_params=pltpu.CompilerParams(
            dimension_semantics=("parallel", "arbitrary"),
            vmem_limit_bytes=VMEM_LIMIT_BYTES,
        ),
    )(idx_p, z)


# ----------------------------------------------------------------------------
# Kernel 3: head  fc4(relu(fc3(pool)))  +  masked log_softmax on padded classes
# ----------------------------------------------------------------------------
def _head_kernel(p_ref, w3t_ref, b3_ref, w4t_ref, b4_ref, o_ref, *, n_class):
    p = p_ref[...].astype(jnp.bfloat16)
    h = jnp.dot(p, w3t_ref[...], preferred_element_type=jnp.float32) + b3_ref[...]
    h = jnp.maximum(h, 0.0).astype(jnp.bfloat16)
    logits = jnp.dot(h, w4t_ref[...], preferred_element_type=jnp.float32) + b4_ref[...]
    # Mask padded class columns so they contribute 0 to the softmax reduction.
    cols = jax.lax.broadcasted_iota(jnp.int32, logits.shape, 1)
    logits = jnp.where(cols < n_class, logits, jnp.float32(-1e30))
    m = jnp.max(logits, axis=1, keepdims=True)
    s = logits - m
    lse = jnp.log(jnp.sum(jnp.exp(s), axis=1, keepdims=True))
    o_ref[...] = s - lse


def head(pooled, wt3, b3, wt4, b4, *, n_class, tile):
    g = pooled.shape[0]
    h2_pad = pooled.shape[1]
    h3_pad = wt3.shape[1]
    c_pad = wt4.shape[1]
    grid = (g // tile,)
    return pl.pallas_call(
        functools.partial(_head_kernel, n_class=n_class),
        out_shape=jax.ShapeDtypeStruct((g, c_pad), jnp.float32),
        grid_spec=pltpu.PrefetchScalarGridSpec(
            num_scalar_prefetch=0,
            grid=grid,
            in_specs=[
                pl.BlockSpec((tile, h2_pad), lambda i: (i, 0)),
                pl.BlockSpec((h2_pad, h3_pad), lambda i: (0, 0)),
                pl.BlockSpec((1, h3_pad), lambda i: (0, 0)),
                pl.BlockSpec((h3_pad, c_pad), lambda i: (0, 0)),
                pl.BlockSpec((1, c_pad), lambda i: (0, 0)),
            ],
            out_specs=pl.BlockSpec((tile, c_pad), lambda i: (i, 0)),
        ),
        compiler_params=pltpu.CompilerParams(
            dimension_semantics=("parallel",),
            vmem_limit_bytes=VMEM_LIMIT_BYTES,
        ),
    )(pooled, wt3, b3, wt4, b4)


# ----------------------------------------------------------------------------
# Parameter init (PyTorch nn.Linear-style uniform) and one-time prep
# (pad feature dims to 128, transpose to [in, out], cast weights to bf16).
# ----------------------------------------------------------------------------
def init_params(key, input_dim, h1, h2, h3, n_class):
    dims = [(h1, input_dim), (h2, h1), (h3, h2), (n_class, h3)]
    params = {}
    for i, (fan_out, fan_in) in enumerate(dims, start=1):
        key, kw, kb = jax.random.split(key, 3)
        bound = 1.0 / jnp.sqrt(float(fan_in))
        params[f"w{i}"] = jax.random.uniform(
            kw, (fan_out, fan_in), jnp.float32, -bound, bound)
        params[f"b{i}"] = jax.random.uniform(
            kb, (fan_out,), jnp.float32, -bound, bound)
    return params


def prepare_params(params):
    """Pad + transpose weights once (no per-call .T / reshape)."""
    prepped = {}
    for i in (1, 2, 3, 4):
        w = params[f"w{i}"]                       # (out, in)
        b = params[f"b{i}"]                       # (out,)
        out_d, in_d = w.shape
        in_p, out_p = _round_up(in_d, LANE), _round_up(out_d, LANE)
        wt = jnp.zeros((in_p, out_p), jnp.float32).at[:in_d, :out_d].set(w.T)
        bp = jnp.zeros((1, out_p), jnp.float32).at[0, :out_d].set(b)
        prepped[f"wt{i}"] = wt.astype(jnp.bfloat16)
        prepped[f"b{i}"] = bp
    return prepped


# ----------------------------------------------------------------------------
# Full forward pass.
# num_graphs (= torch.max(idx)+1 in the reference) is passed statically:
# a data-dependent output shape can't be expressed inside a compiled kernel.
# ----------------------------------------------------------------------------
@functools.partial(jax.jit, static_argnames=("num_graphs", "n_class"))
def gnn_forward(prepped, x_in, adj, idx, *, num_graphs, n_class):
    n, d = x_in.shape
    t_node, n_pad = _tile_and_pad(n, NODE_TILE)
    t_graph, g_pad = _tile_and_pad(num_graphs, GRAPH_TILE)
    d_pad = prepped["wt1"].shape[0]

    # Pad nodes/features; padded adj rows/cols are 0 and padded idx is -1,
    # so padded nodes contribute nothing anywhere.
    x_p = (jnp.zeros((n_pad, d_pad), jnp.float32)
           .at[:n, :d].set(x_in).astype(jnp.bfloat16))
    adj_p = (jnp.zeros((n_pad, n_pad), jnp.float32)
             .at[:n, :n].set(adj).astype(jnp.bfloat16))
    idx_p = jnp.full((1, n_pad), -1, jnp.int32).at[0, :n].set(idx.astype(jnp.int32))

    z0 = gcn_layer(adj_p, x_p, prepped["wt1"], prepped["b1"], tile=t_node)
    z1 = gcn_layer(adj_p, z0, prepped["wt2"], prepped["b2"], tile=t_node)
    pooled = segment_sum_pool(idx_p, z1, g_pad, tg=t_graph, tn=t_node)
    out_pad = head(pooled, prepped["wt3"], prepped["b3"],
                   prepped["wt4"], prepped["b4"],
                   n_class=n_class, tile=t_graph)
    return out_pad[:num_graphs, :n_class]


if __name__ == "__main__":
    key = jax.random.PRNGKey(0)

    # Small synthetic graph batch: 8 nodes total, 2 graphs of 4 nodes each.
    n_nodes, input_dim = 8, 16
    h1, h2, h3, n_class = 32, 32, 32, 4

    key, k_params, k_x, k_adj = jax.random.split(key, 4)
    params = init_params(k_params, input_dim, h1, h2, h3, n_class)
    prepped = prepare_params(params)

    x_in = jax.random.normal(k_x, (n_nodes, input_dim), jnp.float32)

    # 0/1 adjacency with self loops (float, as torch.mm expects).
    adj = (jax.random.uniform(k_adj, (n_nodes, n_nodes)) > 0.5).astype(jnp.float32)
    adj = jnp.minimum(adj + jnp.eye(n_nodes, dtype=jnp.float32), 1.0)

    idx = jnp.array([0, 0, 0, 0, 1, 1, 1, 1], dtype=jnp.int32)
    num_graphs = 2   # == torch.max(idx) + 1, passed statically

    out = gnn_forward(prepped, x_in, adj, idx,
                      num_graphs=num_graphs, n_class=n_class)
    out = jax.block_until_ready(out)

    # Pure-JAX reference of the same math (mirrors the kernels' bf16 casts so
    # the comparison is tight; adj is 0/1 so its cast is exact).
    def bf(a):
        return a.astype(jnp.bfloat16).astype(jnp.float32)

    adj_b, x_b = bf(adj), bf(x_in)
    h = x_b @ bf(params["w1"].T) + params["b1"]
    z0_r = bf(jnp.maximum(adj_b @ bf(h), 0.0))
    h = z0_r @ bf(params["w2"].T) + params["b2"]
    z1_r = bf(jnp.maximum(adj_b @ bf(h), 0.0))
    pooled_r = jax.ops.segment_sum(z1_r, idx, num_segments=num_graphs)
    hh = bf(jnp.maximum(bf(pooled_r) @ bf(params["w3"].T) + params["b3"], 0.0))
    logits = hh @ bf(params["w4"].T) + params["b4"]
    ref = jax.nn.log_softmax(logits, axis=1)

    assert out.shape == (num_graphs, n_class)
    assert bool(jnp.allclose(out, ref, atol=2e-3, rtol=2e-3)), (
        f"max abs diff = {float(jnp.max(jnp.abs(out - ref)))}")

    print("KERNEL_OK")
</pallas_src>

<mosaic_0001>
module attributes {stable_mosaic.version = 11 : i64} {
  func.func @_pool_kernel(%arg0: i32, %arg1: i32, %arg2: memref<1x8xi32, #tpu.memory_space<vmem>>, %arg3: memref<8x128xbf16, #tpu.memory_space<vmem>>, %arg4: memref<8x128xf32, #tpu.memory_space<vmem>>, %arg5: memref<8x128xf32, #tpu.memory_space<vmem>>) attributes {dimension_semantics = [#tpu.dimension_semantics<parallel>, #tpu.dimension_semantics<arbitrary>], iteration_bounds = array<i64: 1, 1>, scalar_prefetch = 0 : i64, scratch_operands = 1 : i64, tpu.core_type = #tpu.core_type<tc>, window_params = [{transform_indices = @transform_0, window_bounds = array<i64: 1, 8>}, {transform_indices = @transform_1, window_bounds = array<i64: 8, 128>}, {transform_indices = @transform_2, window_bounds = array<i64: 8, 128>}]} {
    %c0_i32 = arith.constant 0 : i32
    %0 = arith.cmpi eq, %arg1, %c0_i32 : i32
    %1 = arith.extui %0 : i1 to i32
    %c0_i32_0 = arith.constant 0 : i32
    %2 = arith.cmpi ne, %1, %c0_i32_0 : i32
    scf.if %2 {
      %cst_10 = arith.constant 0.000000e+00 : f32
      %21 = vector.broadcast %cst_10 : f32 to vector<8x128xf32>
      %c0_11 = arith.constant 0 : index
      %c0_12 = arith.constant 0 : index
      %22 = vector.load %arg5[%c0_11, %c0_12] : memref<8x128xf32, #tpu.memory_space<vmem>>, vector<8x128xf32>
      tpu.vector_store %arg5[%c0_11, %c0_12], %21 {strides = array<i32>} : memref<8x128xf32, #tpu.memory_space<vmem>>, vector<8x128xf32>,
    } else {
    }
    %c8_i32 = arith.constant 8 : i32
    %3 = arith.muli %arg0, %c8_i32 : i32
    %4 = tpu.iota {dimensions = array<i32: 0>} : vector<8x8xi32>
    %5 = vector.broadcast %3 : i32 to vector<8x8xi32>
    %6 = arith.addi %5, %4 : vector<8x8xi32>
    %c0 = arith.constant 0 : index
    %c0_1 = arith.constant 0 : index
    %7 = vector.load %arg2[%c0, %c0_1] : memref<1x8xi32, #tpu.memory_space<vmem>>, vector<1x8xi32>
    %8 = vector.broadcast %7 : vector<1x8xi32> to vector<8x8xi32>
    %9 = arith.cmpi eq, %8, %6 : vector<8x8xi32>
    %10 = arith.extui %9 : vector<8x8xi1> to vector<8x8xi32>
    %11 = arith.sitofp %10 : vector<8x8xi32> to vector<8x8xf32>
    %12 = arith.truncf %11 : vector<8x8xf32> to vector<8x8xbf16>
    %c0_2 = arith.constant 0 : index
    %c0_3 = arith.constant 0 : index
    %13 = vector.load %arg5[%c0_2, %c0_3] : memref<8x128xf32, #tpu.memory_space<vmem>>, vector<8x128xf32>
    %c0_4 = arith.constant 0 : index
    %c0_5 = arith.constant 0 : index
    %14 = vector.load %arg3[%c0_4, %c0_5] : memref<8x128xbf16, #tpu.memory_space<vmem>>, vector<8x128xbf16>
    %cst = arith.constant dense<0.000000e+00> : vector<8x128xf32>
    %15 = tpu.matmul %12, %14, %cst {dimension_numbers = #tpu.dot_dimension_numbers<[1], [0], [0], [1], [0, 0, 1, 1], [], []>} : vector<8x8xbf16>, vector<8x128xbf16>, vector<8x128xf32> -> vector<8x128xf32>
    %16 = arith.addf %13, %15 : vector<8x128xf32>
    %c0_6 = arith.constant 0 : index
    %c0_7 = arith.constant 0 : index
    %17 = vector.load %arg5[%c0_6, %c0_7] : memref<8x128xf32, #tpu.memory_space<vmem>>, vector<8x128xf32>
    tpu.vector_store %arg5[%c0_6, %c0_7], %16 {strides = array<i32>} : memref<8x128xf32, #tpu.memory_space<vmem>>, vector<8x128xf32>,
    %c0_i32_8 = arith.constant 0 : i32
    %18 = arith.cmpi eq, %arg1, %c0_i32_8 : i32
    %19 = arith.extui %18 : i1 to i32
    %c0_i32_9 = arith.constant 0 : i32
    %20 = arith.cmpi ne, %19, %c0_i32_9 : i32
    scf.if %20 {
      %c0_10 = arith.constant 0 : index
      %c0_11 = arith.constant 0 : index
      %21 = vector.load %arg5[%c0_10, %c0_11] : memref<8x128xf32, #tpu.memory_space<vmem>>, vector<8x128xf32>
      %c0_12 = arith.constant 0 : index
      %c0_13 = arith.constant 0 : index
      %22 = vector.load %arg4[%c0_12, %c0_13] : memref<8x128xf32, #tpu.memory_space<vmem>>, vector<8x128xf32>
      tpu.vector_store %arg4[%c0_12, %c0_13], %21 {strides = array<i32>} : memref<8x128xf32, #tpu.memory_space<vmem>>, vector<8x128xf32>,
    } else {
    }
    return
  }
  func.func @transform_0(%arg0: i32, %arg1: i32) -> (i32, i32) {
    %c0_i32 = arith.constant 0 : i32
    %c0_i32_0 = arith.constant 0 : i32
    return %c0_i32, %arg1 : i32, i32
  }
  func.func @transform_1(%arg0: i32, %arg1: i32) -> (i32, i32) {
    %c0_i32 = arith.constant 0 : i32
    %c0_i32_0 = arith.constant 0 : i32
    return %arg1, %c0_i32 : i32, i32
  }
  func.func @transform_2(%arg0: i32, %arg1: i32) -> (i32, i32) {
    %c0_i32 = arith.constant 0 : i32
    %c0_i32_0 = arith.constant 0 : i32
    return %arg0, %c0_i32 : i32, i32
  }
}

module attributes {stable_mosaic.version = 11 : i64} {
  func.func @_gcn_layer_kernel(%arg0: i32, %arg1: i32, %arg2: memref<8x8xbf16, #tpu.memory_space<vmem>>, %arg3: memref<8x128xbf16, #tpu.memory_space<vmem>>, %arg4: memref<128x128xbf16, #tpu.memory_space<vmem>>, %arg5: memref<1x128xf32, #tpu.memory_space<vmem>>, %arg6: memref<8x128xbf16, #tpu.memory_space<vmem>>, %arg7: memref<8x128xf32, #tpu.memory_space<vmem>>) attributes {dimension_semantics = [#tpu.dimension_semantics<parallel>, #tpu.dimension_semantics<arbitrary>], iteration_bounds = array<i64: 1, 1>, scalar_prefetch = 0 : i64, scratch_operands = 1 : i64, tpu.core_type = #tpu.core_type<tc>, window_params = [{transform_indices = @transform_0, window_bounds = array<i64: 8, 8>}, {transform_indices = @transform_1, window_bounds = array<i64: 8, 128>}, {pipeline_mode = #tpu.pipeline_mode<synchronous>, transform_indices = @transform_2, window_bounds = array<i64: 128, 128>}, {pipeline_mode = #tpu.pipeline_mode<synchronous>, transform_indices = @transform_3, window_bounds = array<i64: 1, 128>}, {transform_indices = @transform_4, window_bounds = array<i64: 8, 128>}]} {
    %c0_i32 = arith.constant 0 : i32
    %0 = arith.cmpi eq, %arg1, %c0_i32 : i32
    %1 = arith.extui %0 : i1 to i32
    %c0_i32_0 = arith.constant 0 : i32
    %2 = arith.cmpi ne, %1, %c0_i32_0 : i32
    scf.if %2 {
      %cst_15 = arith.constant 0.000000e+00 : f32
      %18 = vector.broadcast %cst_15 : f32 to vector<8x128xf32>
      %c0_16 = arith.constant 0 : index
      %c0_17 = arith.constant 0 : index
      %19 = vector.load %arg7[%c0_16, %c0_17] : memref<8x128xf32, #tpu.memory_space<vmem>>, vector<8x128xf32>
      tpu.vector_store %arg7[%c0_16, %c0_17], %18 {strides = array<i32>} : memref<8x128xf32, #tpu.memory_space<vmem>>, vector<8x128xf32>,
    } else {
    }
    %c0 = arith.constant 0 : index
    %c0_1 = arith.constant 0 : index
    %3 = vector.load %arg3[%c0, %c0_1] : memref<8x128xbf16, #tpu.memory_space<vmem>>, vector<8x128xbf16>
    %c0_2 = arith.constant 0 : index
    %c0_3 = arith.constant 0 : index
    %4 = vector.load %arg4[%c0_2, %c0_3] : memref<128x128xbf16, #tpu.memory_space<vmem>>, vector<128x128xbf16>
    %cst = arith.constant dense<0.000000e+00> : vector<8x128xf32>
    %5 = tpu.matmul %3, %4, %cst {dimension_numbers = #tpu.dot_dimension_numbers<[1], [0], [0], [1], [0, 0, 1, 1], [], []>} : vector<8x128xbf16>, vector<128x128xbf16>, vector<8x128xf32> -> vector<8x128xf32>
    %c0_4 = arith.constant 0 : index
    %c0_5 = arith.constant 0 : index
    %6 = vector.load %arg5[%c0_4, %c0_5] : memref<1x128xf32, #tpu.memory_space<vmem>>, vector<1x128xf32>
    %7 = vector.broadcast %6 : vector<1x128xf32> to vector<8x128xf32>
    %8 = arith.addf %5, %7 : vector<8x128xf32>
    %c0_6 = arith.constant 0 : index
    %c0_7 = arith.constant 0 : index
    %9 = vector.load %arg7[%c0_6, %c0_7] : memref<8x128xf32, #tpu.memory_space<vmem>>, vector<8x128xf32>
    %c0_8 = arith.constant 0 : index
    %c0_9 = arith.constant 0 : index
    %10 = vector.load %arg2[%c0_8, %c0_9] : memref<8x8xbf16, #tpu.memory_space<vmem>>, vector<8x8xbf16>
    %11 = arith.truncf %8 : vector<8x128xf32> to vector<8x128xbf16>
    %cst_10 = arith.constant dense<0.000000e+00> : vector<8x128xf32>
    %12 = tpu.matmul %10, %11, %cst_10 {dimension_numbers = #tpu.dot_dimension_numbers<[1], [0], [0], [1], [0, 0, 1, 1], [], []>} : vector<8x8xbf16>, vector<8x128xbf16>, vector<8x128xf32> -> vector<8x128xf32>
    %13 = arith.addf %9, %12 : vector<8x128xf32>
    %c0_11 = arith.constant 0 : index
    %c0_12 = arith.constant 0 : index
    %14 = vector.load %arg7[%c0_11, %c0_12] : memref<8x128xf32, #tpu.memory_space<vmem>>, vector<8x128xf32>
    tpu.vector_store %arg7[%c0_11, %c0_12], %13 {strides = array<i32>} : memref<8x128xf32, #tpu.memory_space<vmem>>, vector<8x128xf32>,
    %c0_i32_13 = arith.constant 0 : i32
    %15 = arith.cmpi eq, %arg1, %c0_i32_13 : i32
    %16 = arith.extui %15 : i1 to i32
    %c0_i32_14 = arith.constant 0 : i32
    %17 = arith.cmpi ne, %16, %c0_i32_14 : i32
    scf.if %17 {
      %c0_15 = arith.constant 0 : index
      %c0_16 = arith.constant 0 : index
      %18 = vector.load %arg7[%c0_15, %c0_16] : memref<8x128xf32, #tpu.memory_space<vmem>>, vector<8x128xf32>
      %cst_17 = arith.constant 0.000000e+00 : f32
      %19 = vector.broadcast %cst_17 : f32 to vector<8x128xf32>
      %20 = arith.maximumf %18, %19 : vector<8x128xf32>
      %21 = arith.truncf %20 : vector<8x128xf32> to vector<8x128xbf16>
      %c0_18 = arith.constant 0 : index
      %c0_19 = arith.constant 0 : index
      %22 = vector.load %arg6[%c0_18, %c0_19] : memref<8x128xbf16, #tpu.memory_space<vmem>>, vector<8x128xbf16>
      tpu.vector_store %arg6[%c0_18, %c0_19], %21 {strides = array<i32>} : memref<8x128xbf16, #tpu.memory_space<vmem>>, vector<8x128xbf16>,
    } else {
    }
    return
  }
  func.func @transform_0(%arg0: i32, %arg1: i32) -> (i32, i32) {
    %c0_i32 = arith.constant 0 : i32
    return %arg0, %arg1 : i32, i32
  }
  func.func @transform_1(%arg0: i32, %arg1: i32) -> (i32, i32) {
    %c0_i32 = arith.constant 0 : i32
    %c0_i32_0 = arith.constant 0 : i32
    return %arg1, %c0_i32 : i32, i32
  }
  func.func @transform_2(%arg0: i32, %arg1: i32) -> (i32, i32) {
    %c0_i32 = arith.constant 0 : i32
    %c0_i32_0 = arith.constant 0 : i32
    %c0_i32_1 = arith.constant 0 : i32
    return %c0_i32, %c0_i32_0 : i32, i32
  }
  func.func @transform_3(%arg0: i32, %arg1: i32) -> (i32, i32) {
    %c0_i32 = arith.constant 0 : i32
    %c0_i32_0 = arith.constant 0 : i32
    %c0_i32_1 = arith.constant 0 : i32
    return %c0_i32, %c0_i32_0 : i32, i32
  }
  func.func @transform_4(%arg0: i32, %arg1: i32) -> (i32, i32) {
    %c0_i32 = arith.constant 0 : i32
    %c0_i32_0 = arith.constant 0 : i32
    return %arg0, %c0_i32 : i32, i32
  }
}

module attributes {stable_mosaic.version = 11 : i64} {
  func.func @_head_kernel(%arg0: i32, %arg1: memref<8x128xf32, #tpu.memory_space<vmem>>, %arg2: memref<128x128xbf16, #tpu.memory_space<vmem>>, %arg3: memref<1x128xf32, #tpu.memory_space<vmem>>, %arg4: memref<128x128xbf16, #tpu.memory_space<vmem>>, %arg5: memref<1x128xf32, #tpu.memory_space<vmem>>, %arg6: memref<8x128xf32, #tpu.memory_space<vmem>>) attributes {dimension_semantics = [#tpu.dimension_semantics<parallel>], iteration_bounds = array<i64: 1>, scalar_prefetch = 0 : i64, scratch_operands = 0 : i64, tpu.core_type = #tpu.core_type<tc>, window_params = [{transform_indices = @transform_0, window_bounds = array<i64: 8, 128>}, {pipeline_mode = #tpu.pipeline_mode<synchronous>, transform_indices = @transform_1, window_bounds = array<i64: 128, 128>}, {pipeline_mode = #tpu.pipeline_mode<synchronous>, transform_indices = @transform_2, window_bounds = array<i64: 1, 128>}, {pipeline_mode = #tpu.pipeline_mode<synchronous>, transform_indices = @transform_3, window_bounds = array<i64: 128, 128>}, {pipeline_mode = #tpu.pipeline_mode<synchronous>, transform_indices = @transform_4, window_bounds = array<i64: 1, 128>}, {transform_indices = @transform_5, window_bounds = array<i64: 8, 128>}]} {
    %c0 = arith.constant 0 : index
    %c0_0 = arith.constant 0 : index
    %0 = vector.load %arg1[%c0, %c0_0] : memref<8x128xf32, #tpu.memory_space<vmem>>, vector<8x128xf32>
    %1 = arith.truncf %0 : vector<8x128xf32> to vector<8x128xbf16>
    %c0_1 = arith.constant 0 : index
    %c0_2 = arith.constant 0 : index
    %2 = vector.load %arg2[%c0_1, %c0_2] : memref<128x128xbf16, #tpu.memory_space<vmem>>, vector<128x128xbf16>
    %cst = arith.constant dense<0.000000e+00> : vector<8x128xf32>
    %3 = tpu.matmul %1, %2, %cst {dimension_numbers = #tpu.dot_dimension_numbers<[1], [0], [0], [1], [0, 0, 1, 1], [], []>} : vector<8x128xbf16>, vector<128x128xbf16>, vector<8x128xf32> -> vector<8x128xf32>
    %c0_3 = arith.constant 0 : index
    %c0_4 = arith.constant 0 : index
    %4 = vector.load %arg3[%c0_3, %c0_4] : memref<1x128xf32, #tpu.memory_space<vmem>>, vector<1x128xf32>
    %5 = vector.broadcast %4 : vector<1x128xf32> to vector<8x128xf32>
    %6 = arith.addf %3, %5 : vector<8x128xf32>
    %cst_5 = arith.constant 0.000000e+00 : f32
    %7 = vector.broadcast %cst_5 : f32 to vector<8x128xf32>
    %8 = arith.maximumf %6, %7 : vector<8x128xf32>
    %9 = arith.truncf %8 : vector<8x128xf32> to vector<8x128xbf16>
    %c0_6 = arith.constant 0 : index
    %c0_7 = arith.constant 0 : index
    %10 = vector.load %arg4[%c0_6, %c0_7] : memref<128x128xbf16, #tpu.memory_space<vmem>>, vector<128x128xbf16>
    %cst_8 = arith.constant dense<0.000000e+00> : vector<8x128xf32>
    %11 = tpu.matmul %9, %10, %cst_8 {dimension_numbers = #tpu.dot_dimension_numbers<[1], [0], [0], [1], [0, 0, 1, 1], [], []>} : vector<8x128xbf16>, vector<128x128xbf16>, vector<8x128xf32> -> vector<8x128xf32>
    %c0_9 = arith.constant 0 : index
    %c0_10 = arith.constant 0 : index
    %12 = vector.load %arg5[%c0_9, %c0_10] : memref<1x128xf32, #tpu.memory_space<vmem>>, vector<1x128xf32>
    %13 = vector.broadcast %12 : vector<1x128xf32> to vector<8x128xf32>
    %14 = arith.addf %11, %13 : vector<8x128xf32>
    %15 = tpu.iota {dimensions = array<i32: 1>} : vector<8x128xi32>
    %c4_i32 = arith.constant 4 : i32
    %16 = vector.broadcast %c4_i32 : i32 to vector<8x128xi32>
    %17 = arith.cmpi slt, %15, %16 : vector<8x128xi32>
    %cst_11 = arith.constant -1.000000e+30 : f32
    %18 = vector.broadcast %cst_11 : f32 to vector<8x128xf32>
    %19 = arith.select %17, %14, %18 : vector<8x128xi1>, vector<8x128xf32>
    %cst_12 = arith.constant dense<0xFF800000> : vector<8xf32>
    %20 = vector.multi_reduction <maximumf>, %19, %cst_12 [1] : vector<8x128xf32> to vector<8xf32>
    %21 = vector.shape_cast %20 : vector<8xf32> to vector<8x1xf32>
    %22 = vector.broadcast %21 : vector<8x1xf32> to vector<8x128xf32>
    %23 = arith.subf %19, %22 : vector<8x128xf32>
    %24 = math.exp %23 : vector<8x128xf32>
    %cst_13 = arith.constant dense<0.000000e+00> : vector<8xf32>
    %25 = vector.multi_reduction <add>, %24, %cst_13 [1] : vector<8x128xf32> to vector<8xf32>
    %26 = vector.shape_cast %25 : vector<8xf32> to vector<8x1xf32>
    %27 = math.log %26 : vector<8x1xf32>
    %28 = vector.broadcast %27 : vector<8x1xf32> to vector<8x128xf32>
    %29 = arith.subf %23, %28 : vector<8x128xf32>
    %c0_14 = arith.constant 0 : index
    %c0_15 = arith.constant 0 : index
    %30 = vector.load %arg6[%c0_14, %c0_15] : memref<8x128xf32, #tpu.memory_space<vmem>>, vector<8x128xf32>
    tpu.vector_store %arg6[%c0_14, %c0_15], %29 {strides = array<i32>} : memref<8x128xf32, #tpu.memory_space<vmem>>, vector<8x128xf32>,
    return
  }
  func.func @transform_0(%arg0: i32) -> (i32, i32) {
    %c0_i32 = arith.constant 0 : i32
    %c0_i32_0 = arith.constant 0 : i32
    return %arg0, %c0_i32 : i32, i32
  }
  func.func @transform_1(%arg0: i32) -> (i32, i32) {
    %c0_i32 = arith.constant 0 : i32
    %c0_i32_0 = arith.constant 0 : i32
    %c0_i32_1 = arith.constant 0 : i32
    return %c0_i32, %c0_i32_0 : i32, i32
  }
  func.func @transform_2(%arg0: i32) -> (i32, i32) {
    %c0_i32 = arith.constant 0 : i32
    %c0_i32_0 = arith.constant 0 : i32
    %c0_i32_1 = arith.constant 0 : i32
    return %c0_i32, %c0_i32_0 : i32, i32
  }
  func.func @transform_3(%arg0: i32) -> (i32, i32) {
    %c0_i32 = arith.constant 0 : i32
    %c0_i32_0 = arith.constant 0 : i32
    %c0_i32_1 = arith.constant 0 : i32
    return %c0_i32, %c0_i32_0 : i32, i32
  }
  func.func @transform_4(%arg0: i32) -> (i32, i32) {
    %c0_i32 = arith.constant 0 : i32
    %c0_i32_0 = arith.constant 0 : i32
    %c0_i32_1 = arith.constant 0 : i32
    return %c0_i32, %c0_i32_0 : i32, i32
  }
  func.func @transform_5(%arg0: i32) -> (i32, i32) {
    %c0_i32 = arith.constant 0 : i32
    %c0_i32_0 = arith.constant 0 : i32
    return %arg0, %c0_i32 : i32, i32
  }
}

module attributes {stable_mosaic.version = 11 : i64} {
  func.func @_gcn_layer_kernel(%arg0: i32, %arg1: i32, %arg2: memref<8x8xbf16, #tpu.memory_space<vmem>>, %arg3: memref<8x128xbf16, #tpu.memory_space<vmem>>, %arg4: memref<128x128xbf16, #tpu.memory_space<vmem>>, %arg5: memref<1x128xf32, #tpu.memory_space<vmem>>, %arg6: memref<8x128xbf16, #tpu.memory_space<vmem>>, %arg7: memref<8x128xf32, #tpu.memory_space<vmem>>) attributes {dimension_semantics = [#tpu.dimension_semantics<parallel>, #tpu.dimension_semantics<arbitrary>], iteration_bounds = array<i64: 1, 1>, scalar_prefetch = 0 : i64, scratch_operands = 1 : i64, tpu.core_type = #tpu.core_type<tc>, window_params = [{transform_indices = @transform_0, window_bounds = array<i64: 8, 8>}, {transform_indices = @transform_1, window_bounds = array<i64: 8, 128>}, {pipeline_mode = #tpu.pipeline_mode<synchronous>, transform_indices = @transform_2, window_bounds = array<i64: 128, 128>}, {pipeline_mode = #tpu.pipeline_mode<synchronous>, transform_indices = @transform_3, window_bounds = array<i64: 1, 128>}, {transform_indices = @transform_4, window_bounds = array<i64: 8, 128>}]} {
    %c0_i32 = arith.constant 0 : i32
    %0 = arith.cmpi eq, %arg1, %c0_i32 : i32
    %1 = arith.extui %0 : i1 to i32
    %c0_i32_0 = arith.constant 0 : i32
    %2 = arith.cmpi ne, %1, %c0_i32_0 : i32
    scf.if %2 {
      %cst_15 = arith.constant 0.000000e+00 : f32
      %18 = vector.broadcast %cst_15 : f32 to vector<8x128xf32>
      %c0_16 = arith.constant 0 : index
      %c0_17 = arith.constant 0 : index
      %19 = vector.load %arg7[%c0_16, %c0_17] : memref<8x128xf32, #tpu.memory_space<vmem>>, vector<8x128xf32>
      tpu.vector_store %arg7[%c0_16, %c0_17], %18 {strides = array<i32>} : memref<8x128xf32, #tpu.memory_space<vmem>>, vector<8x128xf32>,
    } else {
    }
    %c0 = arith.constant 0 : index
    %c0_1 = arith.constant 0 : index
    %3 = vector.load %arg3[%c0, %c0_1] : memref<8x128xbf16, #tpu.memory_space<vmem>>, vector<8x128xbf16>
    %c0_2 = arith.constant 0 : index
    %c0_3 = arith.constant 0 : index
    %4 = vector.load %arg4[%c0_2, %c0_3] : memref<128x128xbf16, #tpu.memory_space<vmem>>, vector<128x128xbf16>
    %cst = arith.constant dense<0.000000e+00> : vector<8x128xf32>
    %5 = tpu.matmul %3, %4, %cst {dimension_numbers = #tpu.dot_dimension_numbers<[1], [0], [0], [1], [0, 0, 1, 1], [], []>} : vector<8x128xbf16>, vector<128x128xbf16>, vector<8x128xf32> -> vector<8x128xf32>
    %c0_4 = arith.constant 0 : index
    %c0_5 = arith.constant 0 : index
    %6 = vector.load %arg5[%c0_4, %c0_5] : memref<1x128xf32, #tpu.memory_space<vmem>>, vector<1x128xf32>
    %7 = vector.broadcast %6 : vector<1x128xf32> to vector<8x128xf32>
    %8 = arith.addf %5, %7 : vector<8x128xf32>
    %c0_6 = arith.constant 0 : index
    %c0_7 = arith.constant 0 : index
    %9 = vector.load %arg7[%c0_6, %c0_7] : memref<8x128xf32, #tpu.memory_space<vmem>>, vector<8x128xf32>
    %c0_8 = arith.constant 0 : index
    %c0_9 = arith.constant 0 : index
    %10 = vector.load %arg2[%c0_8, %c0_9] : memref<8x8xbf16, #tpu.memory_space<vmem>>, vector<8x8xbf16>
    %11 = arith.truncf %8 : vector<8x128xf32> to vector<8x128xbf16>
    %cst_10 = arith.constant dense<0.000000e+00> : vector<8x128xf32>
    %12 = tpu.matmul %10, %11, %cst_10 {dimension_numbers = #tpu.dot_dimension_numbers<[1], [0], [0], [1], [0, 0, 1, 1], [], []>} : vector<8x8xbf16>, vector<8x128xbf16>, vector<8x128xf32> -> vector<8x128xf32>
    %13 = arith.addf %9, %12 : vector<8x128xf32>
    %c0_11 = arith.constant 0 : index
    %c0_12 = arith.constant 0 : index
    %14 = vector.load %arg7[%c0_11, %c0_12] : memref<8x128xf32, #tpu.memory_space<vmem>>, vector<8x128xf32>
    tpu.vector_store %arg7[%c0_11, %c0_12], %13 {strides = array<i32>} : memref<8x128xf32, #tpu.memory_space<vmem>>, vector<8x128xf32>,
    %c0_i32_13 = arith.constant 0 : i32
    %15 = arith.cmpi eq, %arg1, %c0_i32_13 : i32
    %16 = arith.extui %15 : i1 to i32
    %c0_i32_14 = arith.constant 0 : i32
    %17 = arith.cmpi ne, %16, %c0_i32_14 : i32
    scf.if %17 {
      %c0_15 = arith.constant 0 : index
      %c0_16 = arith.constant 0 : index
      %18 = vector.load %arg7[%c0_15, %c0_16] : memref<8x128xf32, #tpu.memory_space<vmem>>, vector<8x128xf32>
      %cst_17 = arith.constant 0.000000e+00 : f32
      %19 = vector.broadcast %cst_17 : f32 to vector<8x128xf32>
      %20 = arith.maximumf %18, %19 : vector<8x128xf32>
      %21 = arith.truncf %20 : vector<8x128xf32> to vector<8x128xbf16>
      %c0_18 = arith.constant 0 : index
      %c0_19 = arith.constant 0 : index
      %22 = vector.load %arg6[%c0_18, %c0_19] : memref<8x128xbf16, #tpu.memory_space<vmem>>, vector<8x128xbf16>
      tpu.vector_store %arg6[%c0_18, %c0_19], %21 {strides = array<i32>} : memref<8x128xbf16, #tpu.memory_space<vmem>>, vector<8x128xbf16>,
    } else {
    }
    return
  }
  func.func @transform_0(%arg0: i32, %arg1: i32) -> (i32, i32) {
    %c0_i32 = arith.constant 0 : i32
    return %arg0, %arg1 : i32, i32
  }
  func.func @transform_1(%arg0: i32, %arg1: i32) -> (i32, i32) {
    %c0_i32 = arith.constant 0 : i32
    %c0_i32_0 = arith.constant 0 : i32
    return %arg1, %c0_i32 : i32, i32
  }
  func.func @transform_2(%arg0: i32, %arg1: i32) -> (i32, i32) {
    %c0_i32 = arith.constant 0 : i32
    %c0_i32_0 = arith.constant 0 : i32
    %c0_i32_1 = arith.constant 0 : i32
    return %c0_i32, %c0_i32_0 : i32, i32
  }
  func.func @transform_3(%arg0: i32, %arg1: i32) -> (i32, i32) {
    %c0_i32 = arith.constant 0 : i32
    %c0_i32_0 = arith.constant 0 : i32
    %c0_i32_1 = arith.constant 0 : i32
    return %c0_i32, %c0_i32_0 : i32, i32
  }
  func.func @transform_4(%arg0: i32, %arg1: i32) -> (i32, i32) {
    %c0_i32 = arith.constant 0 : i32
    %c0_i32_0 = arith.constant 0 : i32
    return %arg0, %c0_i32 : i32, i32
  }
}

</mosaic_0001>

<bundles_post_ra>
// kernel: gnn_forward.6
= control target key start
LH: loop header
LB: loop body
LE: loop exit
PB: predicated region body
PF: predicated region fallthrough
CT: control target
= control target key end

     0   :  { %v18_v0 = vlaneseq  ;;  %vm37_vm0 = vcmask 1043456   ;;  %v105_v2 = vmov 0.0   ;;  %vm106_vm1 = vmmov 0   ;;  %s131_s0 = inlined_call_operand.vmem [shape: s32[1,8], index: 0, kind: input, shape index: {}]   ;;  %s132_s1 = inlined_call_operand.vmem [shape: bf16[8,128], index: 1, kind: input, shape index: {}]   ;;  %s133_s2 = inlined_call_operand.vmem [shape: f32[8,128], index: 2, kind: output, shape index: {}]  }
   0x1   :  { %v92_v1 = vld [vmem:[%s131_s0] ss:$0 sm:$0xff]  ;;  %97 = vmatprep.subr.bf16.mxu0 %v105_v2  ;;  %99 = vmatprep.mubr.msk.bf16.mxu0 %vm106_vm1, %v105_v2  ;;  %vm33_vm3 = vcmask 64512  }
   0x2   :  { %v32_v3 = vld [vmem:[%s132_s1] sm:$0xf]  ;;  %v19_v4 = vshrl.u32 %v18_v0, 7 }
   0x3   :  { %v39_v5 = vsel %vm37_vm0, %v32_v3, 0 }
   0x4   :  { %98 = vmatpush3.bf16.msra.mxu0 %v39_v5  ;;  %vm27_vm2 = vcmp.eq.s32.totalorder %v92_v1, %v19_v4 }
   0x5   :  { %v93_v6 = vsel %vm27_vm2, 1.0, %v105_v2 }
   0x6   :  { %v30_v7 = vpack.c.bf16 %v93_v6, %v93_v6 }
   0x8   :  { %100 = vmatmul.mubr.msk.bf16.vlgmr.msra.gmra.mrb[0].mxu0 %vm33_vm3, %v30_v7 }
  0xdb   :  { %v75_v8 = vpop.f32.mrb[0].mxu0 }
  0xdc   :  { %87 = vst [vmem:[%s133_s2] sm:$0xff] %v75_v8  ;;  %v101_v9 = vpop.f32.mrb[1].mxu0 }
  0xdd   :  { %v78_v10 = vpop.f32.mrb[2].mxu0 }
  0xde   :  { %v102_v11 = vpop.f32.mrb[3].mxu0 }

// kernel: gnn_forward.4
= control target key start
LH: loop header
LB: loop body
LE: loop exit
PB: predicated region body
PF: predicated region fallthrough
CT: control target
= control target key end

     0   :  { %9 = vsyncpa [#allocation4], 0  ;;  %s400_s0 = inlined_call_operand.vmem [shape: bf16[8,8], index: 0, kind: input, shape index: {}]   ;;  %s401_s1 = inlined_call_operand.vmem [shape: bf16[8,128], index: 1, kind: input, shape index: {}]   ;;  %s402_s2 = inlined_call_operand.hbm [shape: bf16[128,128], index: 2, kind: input, shape index: {}]   ;;  %s403_s3 = inlined_call_operand.hbm [shape: f32[1,128], index: 3, kind: input, shape index: {}]   ;;  %s404_s4 = inlined_call_operand.vmem [shape: bf16[8,128], index: 4, kind: output, shape index: {}]  }
   0x1   :  { %10 = vsyncpa [#allocation6], 0  ;;  %s336_s15 = smov [#allocation3]   ;;  %s288_s19 = scalar_lea.hbm %s402_s2, 1024 }
   0x2   :  { %s20_s16 = sshll.u32 %s336_s15, 4  ;;  %p289_p0 = scmp.ne.s32.totalorder %s402_s2, %s288_s19  ;;  %s21_s16 = int_to_ptr.vmem [resolvable:$true] %s20_s16 }
   0x3   :  { %p292_p1 = scmp.lt.u32.totalorder %s288_s19, %s402_s2 }
   0x5   :  { %p294_p2 = pnand %p292_p1, %p289_p0 }
   0x7   :  { %297 = shalt.err (!%p294_p2)
}
   0x8   :  { %s298_s24 = scalar_lea.vmem %s21_s16, 1024  ;;  %p303_p4 = scmp.lt.s32.totalorder %s21_s16, %s21_s16 }
   0x9   :  { %p299_p3 = scmp.ne.s32.totalorder %s21_s16, %s298_s24  ;;  %p304_p5 = scmp.lt.s32.totalorder %s298_s24, %s298_s24 }
   0xb   :  { %p305_p6 = por %p304_p5, %p303_p4 }
   0xd   :  { %p306_p7 = pnand %p305_p6, %p299_p3 }
   0xf   :  { %309 = shalt.err (!%p306_p7)
}
  0x10   :  { %s337_s25 = smov 64   ;;  %s338_s26 = smov 4  }
  0x11   :  { %26 = dma.hbm_to_vmem [thread:$0]  %s402_s2, 1024, %s21_s16, [#allocation4], %s337_s25, %s337_s25, %s338_s26  }
  0x12   :  { %s339_s29 = smov [#allocation5]   ;;  %s310_s7 = scalar_lea.hbm %s403_s3, 16 }
  0x13   :  { %s33_s30 = sshll.u32 %s339_s29, 4  ;;  %p311_p8 = scmp.ne.s32.totalorder %s403_s3, %s310_s7  ;;  %s34_s30 = int_to_ptr.vmem [resolvable:$true] %s33_s30 }
  0x14   :  { %p314_p9 = scmp.lt.u32.totalorder %s310_s7, %s403_s3 }
  0x16   :  { %p316_p10 = pnand %p314_p9, %p311_p8 }
  0x18   :  { %319 = shalt.err (!%p316_p10)
}
  0x19   :  { %s320_s12 = scalar_lea.vmem %s34_s30, 16  ;;  %s324_s2 = scalar_lea.vmem %s34_s30, 32 }
  0x1a   :  { %p321_p11 = scmp.ne.s32.totalorder %s34_s30, %s320_s12  ;;  %p325_p12 = scmp.lt.s32.totalorder %s34_s30, %s34_s30 }
  0x1b   :  { %p326_p13 = scmp.lt.s32.totalorder %s324_s2, %s320_s12 }
  0x1d   :  { %p327_p0 = por %p326_p13, %p325_p12 }
  0x1f   :  { %p328_p1 = pnand %p327_p0, %p321_p11 }
  0x21   :  { %331 = shalt.err (!%p328_p1)
}
  0x22   :  { %36 = dma.hbm_to_vmem [thread:$0]  %s403_s3, 16, %s34_s30, [#allocation6]  }
  0x23   :  { %332 = dma.done.wait [#allocation4], 1024  }
  0x24   :  { %333 = vsyncadd [#allocation4], 4294966272 }
  0x25   :  { %334 = dma.done.wait [#allocation6], 16  }
  0x26   :  { %335 = vsyncadd [#allocation6], 4294967280  ;;  %v340_v0 = vmov 0.0   ;;  %vm341_vm0 = vmmov 0   ;;  %v280_v1 = vld [vmem:[#allocation3] sm:$0xff]   ;;  %v281_v2 = vld [vmem:[#allocation3 + $0x8] sm:$0xff]  }
  0x27   :  { %248 = vmatprep.subr.bf16.mxu0 %v340_v0  ;;  %264 = vmatprep.mubr.msk.bf16.mxu0 %vm341_vm0, %v340_v0  ;;  %v282_v3 = vld [vmem:[#allocation3 + $0x10] sm:$0xff]   ;;  %v283_v4 = vld [vmem:[#allocation3 + $0x18] sm:$0xff]   ;;  %v284_v5 = vld [vmem:[#allocation3 + $0x20] sm:$0xff]   ;;  %vm168_vm1 = vcmask 1043456   ;;  %vm164_vm2 = vcmask 64512  }
  0x28   :  { %268 = vmatprep.subr.bf16.mxu1 %v340_v0  ;;  %270 = vmatprep.mubr.msk.bf16.mxu1 %vm341_vm0, %v340_v0  ;;  %v285_v6 = vld [vmem:[#allocation3 + $0x28] sm:$0xff]   ;;  %v286_v7 = vld [vmem:[#allocation3 + $0x30] sm:$0xff]   ;;  %v287_v8 = vld [vmem:[#allocation3 + $0x38] sm:$0xff]  }
  0x29   :  { %249 = vmatpush3.bf16.msra.mxu0 %v280_v1  ;;  %v49_v9 = vld [vmem:[%s401_s1] sm:$0xf] }
  0x2a   :  { %250 = vmatprep.subr.bf16.mxu0 %v340_v0  ;;  %v227_v10 = vld [vmem:[#allocation5] ss:$0 sm:$0xff] }
  0x2b   :  { %v162_v18 = vld [vmem:[%s400_s0] sm:$0xf] }
  0x2d   :  { %251 = vmatpush3.bf16.msra.mxu0 %v281_v2 }
  0x2e   :  { %252 = vmatprep.subr.bf16.mxu0 %v340_v0 }
  0x31   :  { %253 = vmatpush3.bf16.msra.mxu0 %v282_v3 }
  0x32   :  { %254 = vmatprep.subr.bf16.mxu0 %v340_v0 }
  0x35   :  { %255 = vmatpush3.bf16.msra.mxu0 %v283_v4 }
  0x36   :  { %256 = vmatprep.subr.bf16.mxu0 %v340_v0 }
  0x39   :  { %257 = vmatpush3.bf16.msra.mxu0 %v284_v5 }
  0x3a   :  { %258 = vmatprep.subr.bf16.mxu0 %v340_v0 }
  0x3d   :  { %259 = vmatpush3.bf16.msra.mxu0 %v285_v6 }
  0x3e   :  { %260 = vmatprep.subr.bf16.mxu0 %v340_v0 }
  0x41   :  { %261 = vmatpush3.bf16.msra.mxu0 %v286_v7 }
  0x42   :  { %262 = vmatprep.subr.bf16.mxu0 %v340_v0 }
  0x45   :  { %263 = vmatpush3.bf16.msra.mxu0 %v287_v8 }
  0x48   :  { %265 = vmatmul.mubr.bf16.vlgmr.msra.gmra.mrb[0].mxu0 %v49_v9 }
 0x11b   :  { %v155_v11 = vpop.f32.mrb[0].mxu0 }
 0x11c   :  { %v156_v12 = vadd.f32 %v227_v10, %v155_v11  ;;  %v266_v13 = vpop.f32.mrb[1].mxu0 }
 0x11d   :  { %v158_v14 = vpop.f32.mrb[2].mxu0 }
 0x11e   :  { %v163_v15 = vpack.c.bf16 %v156_v12, %v156_v12  ;;  %v267_v16 = vpop.f32.mrb[3].mxu0 }
 0x120   :  { %v170_v17 = vsel %vm168_vm1, %v163_v15, 0 }
 0x121   :  { %269 = vmatpush3.bf16.msra.mxu1 %v170_v17 }
 0x124   :  { %271 = vmatmul.mubr.msk.bf16.vlgmr.msra.gmra.mrb[0].mxu1 %vm164_vm2, %v162_v18 }
 0x1f7   :  { %v206_v19 = vpop.f32.mrb[0].mxu1 }
 0x1f8   :  { %v218_v20 = vmax.f32 %v206_v19, 0.0  ;;  %v272_v21 = vpop.f32.mrb[1].mxu1 }
 0x1f9   :  { %v209_v22 = vpop.f32.mrb[2].mxu1 }
 0x1fa   :  { %v219_v23 = vpack.c.bf16 %v218_v20, %v218_v20  ;;  %v273_v24 = vpop.f32.mrb[3].mxu1 }
 0x1fc   :  { %220 = vst [vmem:[%s404_s4] sm:$0xf] %v219_v23 }
 0x1fd   :  { %225 = vsyncpa [#allocation4], 1 }
 0x1fe   :  { %226 = vsyncpa [#allocation6], 1 }

// kernel: gnn_forward.5
= control target key start
LH: loop header
LB: loop body
LE: loop exit
PB: predicated region body
PF: predicated region fallthrough
CT: control target
= control target key end

     0   :  { %v256_v0 = vmov 0.0   ;;  %vm257_vm0 = vmmov 0   ;;  %vm142_vm1 = vcmask 1043456   ;;  %vm138_vm2 = vcmask 64512   ;;  %s319_s2 = inlined_call_operand.vmem [shape: bf16[128,128], index: 2, kind: input, shape index: {}]   ;;  %s320_s1 = inlined_call_operand.vmem [shape: bf16[8,128], index: 1, kind: input, shape index: {}]   ;;  %s321_s3 = inlined_call_operand.vmem [shape: f32[1,128], index: 3, kind: input, shape index: {}]   ;;  %s322_s0 = inlined_call_operand.vmem [shape: bf16[8,8], index: 0, kind: input, shape index: {}]   ;;  %s323_s4 = inlined_call_operand.vmem [shape: bf16[8,128], index: 4, kind: output, shape index: {}]  }
   0x1   :  { %220 = vmatprep.subr.bf16.mxu0 %v256_v0  ;;  %v248_v1 = vld [vmem:[%s319_s2] sm:$0xff]   ;;  %236 = vmatprep.mubr.msk.bf16.mxu0 %vm257_vm0, %v256_v0  ;;  %v249_v2 = vld [vmem:[%s319_s2 + $0x8] sm:$0xff]   ;;  %v250_v3 = vld [vmem:[%s319_s2 + $0x10] sm:$0xff]  }
   0x2   :  { %240 = vmatprep.subr.bf16.mxu1 %v256_v0  ;;  %242 = vmatprep.mubr.msk.bf16.mxu1 %vm257_vm0, %v256_v0  ;;  %v251_v4 = vld [vmem:[%s319_s2 + $0x18] sm:$0xff]   ;;  %v252_v5 = vld [vmem:[%s319_s2 + $0x20] sm:$0xff]   ;;  %v253_v6 = vld [vmem:[%s319_s2 + $0x28] sm:$0xff]  }
   0x3   :  { %221 = vmatpush3.bf16.msra.mxu0 %v248_v1  ;;  %v254_v7 = vld [vmem:[%s319_s2 + $0x30] sm:$0xff]   ;;  %v255_v8 = vld [vmem:[%s319_s2 + $0x38] sm:$0xff]   ;;  %v23_v9 = vld [vmem:[%s320_s1] sm:$0xf] }
   0x4   :  { %222 = vmatprep.subr.bf16.mxu0 %v256_v0  ;;  %v199_v10 = vld [vmem:[%s321_s3] ss:$0 sm:$0xff] }
   0x5   :  { %v136_v18 = vld [vmem:[%s322_s0] sm:$0xf] }
   0x7   :  { %223 = vmatpush3.bf16.msra.mxu0 %v249_v2 }
   0x8   :  { %224 = vmatprep.subr.bf16.mxu0 %v256_v0 }
   0xb   :  { %225 = vmatpush3.bf16.msra.mxu0 %v250_v3 }
   0xc   :  { %226 = vmatprep.subr.bf16.mxu0 %v256_v0 }
   0xf   :  { %227 = vmatpush3.bf16.msra.mxu0 %v251_v4 }
  0x10   :  { %228 = vmatprep.subr.bf16.mxu0 %v256_v0 }
  0x13   :  { %229 = vmatpush3.bf16.msra.mxu0 %v252_v5 }
  0x14   :  { %230 = vmatprep.subr.bf16.mxu0 %v256_v0 }
  0x17   :  { %231 = vmatpush3.bf16.msra.mxu0 %v253_v6 }
  0x18   :  { %232 = vmatprep.subr.bf16.mxu0 %v256_v0 }
  0x1b   :  { %233 = vmatpush3.bf16.msra.mxu0 %v254_v7 }
  0x1c   :  { %234 = vmatprep.subr.bf16.mxu0 %v256_v0 }
  0x1f   :  { %235 = vmatpush3.bf16.msra.mxu0 %v255_v8 }
  0x22   :  { %237 = vmatmul.mubr.bf16.vlgmr.msra.gmra.mrb[0].mxu0 %v23_v9 }
  0xf5   :  { %v129_v11 = vpop.f32.mrb[0].mxu0 }
  0xf6   :  { %v130_v12 = vadd.f32 %v199_v10, %v129_v11  ;;  %v238_v13 = vpop.f32.mrb[1].mxu0 }
  0xf7   :  { %v132_v14 = vpop.f32.mrb[2].mxu0 }
  0xf8   :  { %v137_v15 = vpack.c.bf16 %v130_v12, %v130_v12  ;;  %v239_v16 = vpop.f32.mrb[3].mxu0 }
  0xfa   :  { %v144_v17 = vsel %vm142_vm1, %v137_v15, 0 }
  0xfb   :  { %241 = vmatpush3.bf16.msra.mxu1 %v144_v17 }
  0xfe   :  { %243 = vmatmul.mubr.msk.bf16.vlgmr.msra.gmra.mrb[0].mxu1 %vm138_vm2, %v136_v18 }
 0x1d1   :  { %v180_v19 = vpop.f32.mrb[0].mxu1 }
 0x1d2   :  { %v192_v20 = vmax.f32 %v180_v19, 0.0  ;;  %v244_v21 = vpop.f32.mrb[1].mxu1 }
 0x1d3   :  { %v183_v22 = vpop.f32.mrb[2].mxu1 }
 0x1d4   :  { %v193_v23 = vpack.c.bf16 %v192_v20, %v192_v20  ;;  %v245_v24 = vpop.f32.mrb[3].mxu1 }
 0x1d6   :  { %194 = vst [vmem:[%s323_s4] sm:$0xf] %v193_v23 }

// kernel: gnn_forward.7
= control target key start
LH: loop header
LB: loop body
LE: loop exit
PB: predicated region body
PF: predicated region fallthrough
CT: control target
= control target key end

     0   :  { %v364_v0 = vmov 0.0   ;;  %vm365_vm0 = vmmov 0   ;;  %v247_v27 = vlaneseq  ;;  %s456_s1 = inlined_call_operand.vmem [shape: bf16[128,128], index: 1, kind: input, shape index: {}]   ;;  %s457_s3 = inlined_call_operand.vmem [shape: bf16[128,128], index: 3, kind: input, shape index: {}]   ;;  %s458_s0 = inlined_call_operand.vmem [shape: f32[8,128], index: 0, kind: input, shape index: {}]   ;;  %s459_s2 = inlined_call_operand.vmem [shape: f32[1,128], index: 2, kind: input, shape index: {}]   ;;  %s460_s4 = inlined_call_operand.vmem [shape: f32[1,128], index: 4, kind: input, shape index: {}]   ;;  %s461_s5 = inlined_call_operand.vmem [shape: f32[8,128], index: 5, kind: output, shape index: {}]  }
   0x1   :  { %302 = vmatprep.subr.bf16.mxu0 %v364_v0  ;;  %v344_v1 = vld [vmem:[%s456_s1] sm:$0xff]   ;;  %318 = vmatprep.mubr.msk.bf16.mxu0 %vm365_vm0, %v364_v0  ;;  %v345_v2 = vld [vmem:[%s456_s1 + $0x8] sm:$0xff]   ;;  %v346_v3 = vld [vmem:[%s456_s1 + $0x10] sm:$0xff]  }
   0x2   :  { %322 = vmatprep.subr.bf16.mxu1 %v364_v0  ;;  %338 = vmatprep.mubr.msk.bf16.mxu1 %vm365_vm0, %v364_v0  ;;  %v352_v4 = vld [vmem:[%s457_s3] sm:$0xff]   ;;  %v347_v5 = vld [vmem:[%s456_s1 + $0x18] sm:$0xff]   ;;  %v353_v6 = vld [vmem:[%s457_s3 + $0x8] sm:$0xff]   ;;  %v248_v28 = vand.u32 127, %v247_v27 }
   0x3   :  { %303 = vmatpush3.bf16.msra.mxu0 %v344_v1  ;;  %323 = vmatpush3.bf16.msra.mxu1 %v352_v4  ;;  %v348_v7 = vld [vmem:[%s456_s1 + $0x20] sm:$0xff]   ;;  %v354_v8 = vld [vmem:[%s457_s3 + $0x10] sm:$0xff]   ;;  %v349_v9 = vld [vmem:[%s456_s1 + $0x28] sm:$0xff]  }
   0x4   :  { %304 = vmatprep.subr.bf16.mxu0 %v364_v0  ;;  %324 = vmatprep.subr.bf16.mxu1 %v364_v0  ;;  %v355_v10 = vld [vmem:[%s457_s3 + $0x18] sm:$0xff]   ;;  %v350_v11 = vld [vmem:[%s456_s1 + $0x30] sm:$0xff]   ;;  %v356_v12 = vld [vmem:[%s457_s3 + $0x20] sm:$0xff]   ;;  %vm249_vm1 = vcmp.lt.s32.totalorder %v248_v28, 4 }
   0x5   :  { %v351_v13 = vld [vmem:[%s456_s1 + $0x38] sm:$0xff]   ;;  %v21_v14 = vld [vmem:[%s458_s0] sm:$0xff]  ;;  %v357_v15 = vld [vmem:[%s457_s3 + $0x28] sm:$0xff]  }
   0x6   :  { %v22_v16 = vpack.c.bf16 %v21_v14, %v21_v14  ;;  %v358_v17 = vld [vmem:[%s457_s3 + $0x30] sm:$0xff]   ;;  %v359_v18 = vld [vmem:[%s457_s3 + $0x38] sm:$0xff]   ;;  %v266_v19 = vld [vmem:[%s459_s2] ss:$0 sm:$0xff] }
   0x7   :  { %305 = vmatpush3.bf16.msra.mxu0 %v345_v2  ;;  %325 = vmatpush3.bf16.msra.mxu1 %v353_v6  ;;  %v275_v29 = vld [vmem:[%s460_s4] ss:$0 sm:$0xff] }
   0x8   :  { %306 = vmatprep.subr.bf16.mxu0 %v364_v0  ;;  %326 = vmatprep.subr.bf16.mxu1 %v364_v0 }
   0xb   :  { %307 = vmatpush3.bf16.msra.mxu0 %v346_v3  ;;  %327 = vmatpush3.bf16.msra.mxu1 %v354_v8 }
   0xc   :  { %308 = vmatprep.subr.bf16.mxu0 %v364_v0  ;;  %328 = vmatprep.subr.bf16.mxu1 %v364_v0 }
   0xf   :  { %309 = vmatpush3.bf16.msra.mxu0 %v347_v5  ;;  %329 = vmatpush3.bf16.msra.mxu1 %v355_v10 }
  0x10   :  { %310 = vmatprep.subr.bf16.mxu0 %v364_v0  ;;  %330 = vmatprep.subr.bf16.mxu1 %v364_v0 }
  0x13   :  { %311 = vmatpush3.bf16.msra.mxu0 %v348_v7  ;;  %331 = vmatpush3.bf16.msra.mxu1 %v356_v12 }
  0x14   :  { %312 = vmatprep.subr.bf16.mxu0 %v364_v0  ;;  %332 = vmatprep.subr.bf16.mxu1 %v364_v0 }
  0x17   :  { %313 = vmatpush3.bf16.msra.mxu0 %v349_v9  ;;  %333 = vmatpush3.bf16.msra.mxu1 %v357_v15 }
  0x18   :  { %314 = vmatprep.subr.bf16.mxu0 %v364_v0  ;;  %334 = vmatprep.subr.bf16.mxu1 %v364_v0 }
  0x1b   :  { %315 = vmatpush3.bf16.msra.mxu0 %v350_v11  ;;  %335 = vmatpush3.bf16.msra.mxu1 %v358_v17 }
  0x1c   :  { %316 = vmatprep.subr.bf16.mxu0 %v364_v0  ;;  %336 = vmatprep.subr.bf16.mxu1 %v364_v0 }
  0x1f   :  { %317 = vmatpush3.bf16.msra.mxu0 %v351_v13  ;;  %337 = vmatpush3.bf16.msra.mxu1 %v359_v18 }
  0x22   :  { %319 = vmatmul.mubr.bf16.vlgmr.msra.gmra.mrb[0].mxu0 %v22_v16 }
  0xf5   :  { %v128_v20 = vpop.f32.mrb[0].mxu0 }
  0xf6   :  { %v129_v21 = vadd.f32 %v266_v19, %v128_v20  ;;  %v320_v22 = vpop.f32.mrb[1].mxu0 }
  0xf7   :  { %v131_v23 = vpop.f32.mrb[2].mxu0 }
  0xf8   :  { %v134_v24 = vmax.f32 %v129_v21, 0.0  ;;  %v321_v25 = vpop.f32.mrb[3].mxu0 }
  0xfa   :  { %v135_v26 = vpack.c.bf16 %v134_v24, %v134_v24 }
  0xfc   :  { %339 = vmatmul.mubr.bf16.vlgmr.msra.gmra.mrb[0].mxu1 %v135_v26 }
 0x1cf   :  { %v241_v30 = vpop.f32.mrb[0].mxu1 }
 0x1d0   :  { %v242_v31 = vadd.f32 %v275_v29, %v241_v30  ;;  %v340_v32 = vpop.f32.mrb[1].mxu1 }
 0x1d1   :  { %v244_v33 = vpop.f32.mrb[2].mxu1 }
 0x1d2   :  { %v341_v34 = vpop.f32.mrb[3].mxu1  ;;  %v250_v35 = vsel %vm249_vm1, %v242_v31, -1e+30 }
 0x1d3   :  { %251 = vmax.xlane.f32.xlu0 %v250_v35 }
 0x260   :  { %v252_v36 = vpop.xlane.xlu0 %251 }
 0x261   :  { %v253_v37 = vsub.f32 %v250_v35, %v252_v36 }
 0x263   :  { %v254_v38 = vmul.f32 1.442695, %v253_v37 }
 0x265   :  { %360 = vpow2.f32 %v254_v38 }
 0x26f   :  { %v361_v39 = vpop.eup %360 }
 0x270   :  { %256 = vadd.xlane.f32.xlu0 %v361_v39 }
 0x2fd   :  { %v257_v40 = vpop.xlane.xlu0 %256 }
 0x2fe   :  { %362 = vlog2.f32 %v257_v40 }
 0x308   :  { %v363_v41 = vpop.eup %362 }
 0x309   :  { %v259_v42 = vmul.f32 0.6931472, %v363_v41 }
 0x30b   :  { %v260_v43 = vsub.f32 %v253_v37, %v259_v42 }
 0x30d   :  { %261 = vst [vmem:[%s461_s5] sm:$0xff] %v260_v43 }

</bundles_post_ra>
